<compile_context>
chip_gen: v7x
topology: tpu7x:2x2x1
jax: 0.10.0
libtpu: 0.0.40
codegen_flags: <defaults>
</compile_context>

<pallas_src>
from functools import partial

import jax
import jax.numpy as jnp
from jax.experimental import pallas as pl
from jax.experimental.pallas import tpu as pltpu

LANE = 128  # TPU vreg lane width


def _round_up(v, m):
    return (v + m - 1) // m * m


def mlp_kernel(x_ref, w1_ref, b1_ref, w2_ref, b2_ref, w3_ref, b3_ref, o_ref):
    # Layer 1: Linear + ReLU  (bf16 MXU matmul, f32 accumulation, f32 bias)
    h1 = jnp.dot(x_ref[...], w1_ref[...], preferred_element_type=jnp.float32)
    h1 = jnp.maximum(h1 + b1_ref[...], 0.0)
    # Layer 2: Linear + ReLU
    h2 = jnp.dot(h1.astype(w2_ref.dtype), w2_ref[...],
                 preferred_element_type=jnp.float32)
    h2 = jnp.maximum(h2 + b2_ref[...], 0.0)
    # Layer 3: Linear (logits, no activation) -> lane-dense bf16 store
    out = jnp.dot(h2.astype(w3_ref.dtype), w3_ref[...],
                  preferred_element_type=jnp.float32)
    o_ref[...] = (out + b3_ref[...]).astype(o_ref.dtype)


def prepare_params(params):
    """One-time: lane-pad hidden/class dims to 128 and cast weights to bf16.

    Zero-padding is numerically a no-op for Linear+ReLU (padded columns stay
    exactly 0 and feed zero weight rows). Biases stay f32 (added post-matmul).
    Returns (prepared_param_dict, num_classes).
    """
    w1, b1, w2, b2, w3, b3 = (params["w1"], params["b1"], params["w2"],
                              params["b2"], params["w3"], params["b3"])
    H = w1.shape[1]
    C = w3.shape[1]
    H_pad = _round_up(H, LANE)
    C_pad = _round_up(C, LANE)
    prepared = {
        "w1": jnp.pad(w1, ((0, 0), (0, H_pad - H))).astype(jnp.bfloat16),
        "b1": jnp.pad(b1, ((0, 0), (0, H_pad - H))),
        "w2": jnp.pad(w2, ((0, H_pad - H), (0, H_pad - H))).astype(jnp.bfloat16),
        "b2": jnp.pad(b2, ((0, 0), (0, H_pad - H))),
        "w3": jnp.pad(w3, ((0, H_pad - H), (0, C_pad - C))).astype(jnp.bfloat16),
        "b3": jnp.pad(b3, ((0, 0), (0, C_pad - C))),
    }
    return prepared, C


@partial(jax.jit, static_argnames=("classes", "tile_m"))
def neural_network_forward(x, prepared, *, classes, tile_m=256):
    """x: (B, inputLayer) f32. prepared: output of prepare_params. -> (B, classes) f32."""
    w1, b1, w2, b2, w3, b3 = (prepared["w1"], prepared["b1"], prepared["w2"],
                              prepared["b2"], prepared["w3"], prepared["b3"])
    B, D_in = x.shape
    H_pad = w1.shape[1]
    C_pad = w3.shape[1]

    # Batch tiling: single tile (multiple of 16 for bf16 sublane packing) for
    # small batches; 256-row tiles otherwise so the MXU M dim is fully fed and
    # >= 2 grid steps exist for v7x's second TensorCore on large batches.
    if B <= tile_m:
        tm = _round_up(B, 16)
        B_pad = tm
    else:
        tm = tile_m
        B_pad = _round_up(B, tm)

    # Only x is padded/cast per call; weights were prepared once.
    x_p = jnp.pad(x, ((0, B_pad - B), (0, 0))).astype(jnp.bfloat16)

    grid = (B_pad // tm,)

    out_padded = pl.pallas_call(
        mlp_kernel,
        # Lane-dense bf16 output slab: halves HBM writeback vs f32.
        out_shape=jax.ShapeDtypeStruct((B_pad, C_pad), jnp.bfloat16),
        grid_spec=pltpu.PrefetchScalarGridSpec(
            num_scalar_prefetch=0,
            grid=grid,
            in_specs=[
                # x: tiled over batch.
                pl.BlockSpec((tm, D_in), lambda i: (i, 0)),
                # Weights/biases: constant index_map -> resident in VMEM
                # across all batch tiles (no re-DMA per grid step).
                pl.BlockSpec((D_in, H_pad), lambda i: (0, 0)),
                pl.BlockSpec((1, H_pad), lambda i: (0, 0)),
                pl.BlockSpec((H_pad, H_pad), lambda i: (0, 0)),
                pl.BlockSpec((1, H_pad), lambda i: (0, 0)),
                pl.BlockSpec((H_pad, C_pad), lambda i: (0, 0)),
                pl.BlockSpec((1, C_pad), lambda i: (0, 0)),
            ],
            out_specs=pl.BlockSpec((tm, C_pad), lambda i: (i, 0)),
        ),
        compiler_params=pltpu.CompilerParams(
            dimension_semantics=("parallel",),  # shards batch tiles across v7x's 2 TCs
        ),
    )(x_p, w1, b1, w2, b2, w3, b3)

    # Strip batch/class padding; upcast logits back to f32.
    return out_padded[:B, :classes].astype(jnp.float32)


def init_params(key, input_layer, hidden_layer, classes):
    """Deterministic synthetic init (PyTorch-Linear-like uniform bounds)."""
    ks = jax.random.split(key, 6)

    def linear(kw, kb, fan_in, fan_out):
        bound = 1.0 / jnp.sqrt(fan_in)
        # stored already transposed to (in, out) so kernel computes x @ W + b
        w = jax.random.uniform(kw, (fan_in, fan_out), jnp.float32, -bound, bound)
        b = jax.random.uniform(kb, (1, fan_out), jnp.float32, -bound, bound)
        return w, b

    w1, b1 = linear(ks[0], ks[1], input_layer, hidden_layer)
    w2, b2 = linear(ks[2], ks[3], hidden_layer, hidden_layer)
    w3, b3 = linear(ks[4], ks[5], hidden_layer, classes)
    return {"w1": w1, "b1": b1, "w2": w2, "b2": b2, "w3": w3, "b3": b3}


if __name__ == "__main__":
    input_layer, hidden_layer, classes = 32, 64, 16
    batch = 8

    key = jax.random.PRNGKey(0)
    kx, kp = jax.random.split(key)
    x = jax.random.normal(kx, (batch, input_layer), jnp.float32)
    params = init_params(kp, input_layer, hidden_layer, classes)

    # One-time weight preparation (padding + bf16 cast hoisted out of forward).
    prepared, n_classes = prepare_params(params)

    out = neural_network_forward(x, prepared, classes=n_classes)
    out = jax.block_until_ready(out)

    # Reference with the same bf16-matmul / f32-accumulate / bf16-store math path.
    bf = jnp.bfloat16
    h = jnp.maximum(
        jnp.dot(x.astype(bf), params["w1"].astype(bf),
                preferred_element_type=jnp.float32) + params["b1"], 0.0)
    h = jnp.maximum(
        jnp.dot(h.astype(bf), params["w2"].astype(bf),
                preferred_element_type=jnp.float32) + params["b2"], 0.0)
    ref = jnp.dot(h.astype(bf), params["w3"].astype(bf),
                  preferred_element_type=jnp.float32) + params["b3"]
    ref = ref.astype(bf).astype(jnp.float32)  # match kernel's bf16 output store

    assert out.shape == (batch, classes)
    assert out.dtype == jnp.float32
    assert jnp.allclose(out, ref, atol=2e-2, rtol=2e-2)

    print("KERNEL_OK")
</pallas_src>

<mosaic_0001>
module attributes {stable_mosaic.version = 11 : i64} {
  func.func @mlp_kernel(%arg0: i32, %arg1: memref<16x32xbf16, #tpu.memory_space<vmem>>, %arg2: memref<32x128xbf16, #tpu.memory_space<vmem>>, %arg3: memref<1x128xf32, #tpu.memory_space<vmem>>, %arg4: memref<128x128xbf16, #tpu.memory_space<vmem>>, %arg5: memref<1x128xf32, #tpu.memory_space<vmem>>, %arg6: memref<128x128xbf16, #tpu.memory_space<vmem>>, %arg7: memref<1x128xf32, #tpu.memory_space<vmem>>, %arg8: memref<16x128xbf16, #tpu.memory_space<vmem>>) attributes {dimension_semantics = [#tpu.dimension_semantics<parallel>], iteration_bounds = array<i64: 1>, scalar_prefetch = 0 : i64, scratch_operands = 0 : i64, tpu.core_type = #tpu.core_type<tc>, window_params = [{transform_indices = @transform_0, window_bounds = array<i64: 16, 32>}, {pipeline_mode = #tpu.pipeline_mode<synchronous>, transform_indices = @transform_1, window_bounds = array<i64: 32, 128>}, {pipeline_mode = #tpu.pipeline_mode<synchronous>, transform_indices = @transform_2, window_bounds = array<i64: 1, 128>}, {pipeline_mode = #tpu.pipeline_mode<synchronous>, transform_indices = @transform_3, window_bounds = array<i64: 128, 128>}, {pipeline_mode = #tpu.pipeline_mode<synchronous>, transform_indices = @transform_4, window_bounds = array<i64: 1, 128>}, {pipeline_mode = #tpu.pipeline_mode<synchronous>, transform_indices = @transform_5, window_bounds = array<i64: 128, 128>}, {pipeline_mode = #tpu.pipeline_mode<synchronous>, transform_indices = @transform_6, window_bounds = array<i64: 1, 128>}, {transform_indices = @transform_7, window_bounds = array<i64: 16, 128>}]} {
    %c0 = arith.constant 0 : index
    %c0_0 = arith.constant 0 : index
    %0 = vector.load %arg1[%c0, %c0_0] : memref<16x32xbf16, #tpu.memory_space<vmem>>, vector<16x32xbf16>
    %c0_1 = arith.constant 0 : index
    %c0_2 = arith.constant 0 : index
    %1 = vector.load %arg2[%c0_1, %c0_2] : memref<32x128xbf16, #tpu.memory_space<vmem>>, vector<32x128xbf16>
    %cst = arith.constant dense<0.000000e+00> : vector<16x128xf32>
    %2 = tpu.matmul %0, %1, %cst {dimension_numbers = #tpu.dot_dimension_numbers<[1], [0], [0], [1], [0, 0, 1, 1], [], []>} : vector<16x32xbf16>, vector<32x128xbf16>, vector<16x128xf32> -> vector<16x128xf32>
    %c0_3 = arith.constant 0 : index
    %c0_4 = arith.constant 0 : index
    %3 = vector.load %arg3[%c0_3, %c0_4] : memref<1x128xf32, #tpu.memory_space<vmem>>, vector<1x128xf32>
    %4 = vector.broadcast %3 : vector<1x128xf32> to vector<16x128xf32>
    %5 = arith.addf %2, %4 : vector<16x128xf32>
    %cst_5 = arith.constant 0.000000e+00 : f32
    %6 = vector.broadcast %cst_5 : f32 to vector<16x128xf32>
    %7 = arith.maximumf %5, %6 : vector<16x128xf32>
    %8 = arith.truncf %7 : vector<16x128xf32> to vector<16x128xbf16>
    %c0_6 = arith.constant 0 : index
    %c0_7 = arith.constant 0 : index
    %9 = vector.load %arg4[%c0_6, %c0_7] : memref<128x128xbf16, #tpu.memory_space<vmem>>, vector<128x128xbf16>
    %cst_8 = arith.constant dense<0.000000e+00> : vector<16x128xf32>
    %10 = tpu.matmul %8, %9, %cst_8 {dimension_numbers = #tpu.dot_dimension_numbers<[1], [0], [0], [1], [0, 0, 1, 1], [], []>} : vector<16x128xbf16>, vector<128x128xbf16>, vector<16x128xf32> -> vector<16x128xf32>
    %c0_9 = arith.constant 0 : index
    %c0_10 = arith.constant 0 : index
    %11 = vector.load %arg5[%c0_9, %c0_10] : memref<1x128xf32, #tpu.memory_space<vmem>>, vector<1x128xf32>
    %12 = vector.broadcast %11 : vector<1x128xf32> to vector<16x128xf32>
    %13 = arith.addf %10, %12 : vector<16x128xf32>
    %cst_11 = arith.constant 0.000000e+00 : f32
    %14 = vector.broadcast %cst_11 : f32 to vector<16x128xf32>
    %15 = arith.maximumf %13, %14 : vector<16x128xf32>
    %16 = arith.truncf %15 : vector<16x128xf32> to vector<16x128xbf16>
    %c0_12 = arith.constant 0 : index
    %c0_13 = arith.constant 0 : index
    %17 = vector.load %arg6[%c0_12, %c0_13] : memref<128x128xbf16, #tpu.memory_space<vmem>>, vector<128x128xbf16>
    %cst_14 = arith.constant dense<0.000000e+00> : vector<16x128xf32>
    %18 = tpu.matmul %16, %17, %cst_14 {dimension_numbers = #tpu.dot_dimension_numbers<[1], [0], [0], [1], [0, 0, 1, 1], [], []>} : vector<16x128xbf16>, vector<128x128xbf16>, vector<16x128xf32> -> vector<16x128xf32>
    %c0_15 = arith.constant 0 : index
    %c0_16 = arith.constant 0 : index
    %19 = vector.load %arg7[%c0_15, %c0_16] : memref<1x128xf32, #tpu.memory_space<vmem>>, vector<1x128xf32>
    %20 = vector.broadcast %19 : vector<1x128xf32> to vector<16x128xf32>
    %21 = arith.addf %18, %20 : vector<16x128xf32>
    %22 = arith.truncf %21 : vector<16x128xf32> to vector<16x128xbf16>
    %c0_17 = arith.constant 0 : index
    %c0_18 = arith.constant 0 : index
    %23 = vector.load %arg8[%c0_17, %c0_18] : memref<16x128xbf16, #tpu.memory_space<vmem>>, vector<16x128xbf16>
    tpu.vector_store %arg8[%c0_17, %c0_18], %22 {strides = array<i32>} : memref<16x128xbf16, #tpu.memory_space<vmem>>, vector<16x128xbf16>,
    return
  }
  func.func @transform_0(%arg0: i32) -> (i32, i32) {
    %c0_i32 = arith.constant 0 : i32
    %c0_i32_0 = arith.constant 0 : i32
    return %arg0, %c0_i32 : i32, i32
  }
  func.func @transform_1(%arg0: i32) -> (i32, i32) {
    %c0_i32 = arith.constant 0 : i32
    %c0_i32_0 = arith.constant 0 : i32
    %c0_i32_1 = arith.constant 0 : i32
    return %c0_i32, %c0_i32_0 : i32, i32
  }
  func.func @transform_2(%arg0: i32) -> (i32, i32) {
    %c0_i32 = arith.constant 0 : i32
    %c0_i32_0 = arith.constant 0 : i32
    %c0_i32_1 = arith.constant 0 : i32
    return %c0_i32, %c0_i32_0 : i32, i32
  }
  func.func @transform_3(%arg0: i32) -> (i32, i32) {
    %c0_i32 = arith.constant 0 : i32
    %c0_i32_0 = arith.constant 0 : i32
    %c0_i32_1 = arith.constant 0 : i32
    return %c0_i32, %c0_i32_0 : i32, i32
  }
  func.func @transform_4(%arg0: i32) -> (i32, i32) {
    %c0_i32 = arith.constant 0 : i32
    %c0_i32_0 = arith.constant 0 : i32
    %c0_i32_1 = arith.constant 0 : i32
    return %c0_i32, %c0_i32_0 : i32, i32
  }
  func.func @transform_5(%arg0: i32) -> (i32, i32) {
    %c0_i32 = arith.constant 0 : i32
    %c0_i32_0 = arith.constant 0 : i32
    %c0_i32_1 = arith.constant 0 : i32
    return %c0_i32, %c0_i32_0 : i32, i32
  }
  func.func @transform_6(%arg0: i32) -> (i32, i32) {
    %c0_i32 = arith.constant 0 : i32
    %c0_i32_0 = arith.constant 0 : i32
    %c0_i32_1 = arith.constant 0 : i32
    return %c0_i32, %c0_i32_0 : i32, i32
  }
  func.func @transform_7(%arg0: i32) -> (i32, i32) {
    %c0_i32 = arith.constant 0 : i32
    %c0_i32_0 = arith.constant 0 : i32
    return %arg0, %c0_i32 : i32, i32
  }
}

</mosaic_0001>

<bundles_post_ra>
// kernel: neural_network_forward.1
= control target key start
LH: loop header
LB: loop body
LE: loop exit
PB: predicated region body
PF: predicated region fallthrough
CT: control target
= control target key end

     0   :  { %12 = vsyncpa [#allocation3], 0  ;;  %s665_s0 = inlined_call_operand.vmem [shape: bf16[16,32], index: 0, kind: input, shape index: {}]   ;;  %s666_s1 = inlined_call_operand.vmem [shape: bf16[32,128], index: 1, kind: input, shape index: {}]   ;;  %s667_s2 = inlined_call_operand.vmem [shape: f32[1,128], index: 2, kind: input, shape index: {}]   ;;  %s668_s3 = inlined_call_operand.hbm [shape: bf16[128,128], index: 3, kind: input, shape index: {}]   ;;  %s669_s4 = inlined_call_operand.vmem [shape: f32[1,128], index: 4, kind: input, shape index: {}]   ;;  %s670_s5 = inlined_call_operand.hbm [shape: bf16[128,128], index: 5, kind: input, shape index: {}]   ;;  %s671_s6 = inlined_call_operand.vmem [shape: f32[1,128], index: 6, kind: input, shape index: {}]   ;;  %s672_s7 = inlined_call_operand.vmem [shape: bf16[16,128], index: 7, kind: output, shape index: {}]  }
   0x1   :  { %13 = vsyncpa [#allocation5], 0  ;;  %s550_s24 = smov [#allocation2]   ;;  %s502_s28 = scalar_lea.hbm %s668_s3, 1024 }
   0x2   :  { %s25_s25 = sshll.u32 %s550_s24, 4  ;;  %p503_p0 = scmp.ne.s32.totalorder %s668_s3, %s502_s28  ;;  %s26_s25 = int_to_ptr.vmem [resolvable:$true] %s25_s25 }
   0x3   :  { %p506_p1 = scmp.lt.u32.totalorder %s502_s28, %s668_s3 }
   0x5   :  { %p508_p2 = pnand %p506_p1, %p503_p0 }
   0x7   :  { %511 = shalt.err (!%p508_p2)
}
   0x8   :  { %s512_s10 = scalar_lea.vmem %s26_s25, 1024  ;;  %p517_p4 = scmp.lt.s32.totalorder %s26_s25, %s26_s25 }
   0x9   :  { %p513_p3 = scmp.ne.s32.totalorder %s26_s25, %s512_s10  ;;  %p518_p5 = scmp.lt.s32.totalorder %s512_s10, %s512_s10 }
   0xb   :  { %p519_p6 = por %p518_p5, %p517_p4 }
   0xd   :  { %p520_p7 = pnand %p519_p6, %p513_p3 }
   0xf   :  { %523 = shalt.err (!%p520_p7)
}
  0x10   :  { %s551_s11 = smov 64   ;;  %s552_s12 = smov 4  }
  0x11   :  { %31 = dma.hbm_to_vmem [thread:$0]  %s668_s3, 1024, %s26_s25, [#allocation3], %s551_s11, %s551_s11, %s552_s12  }
  0x12   :  { %s553_s15 = smov [#allocation4]   ;;  %s524_s19 = scalar_lea.hbm %s670_s5, 1024 }
  0x13   :  { %s39_s16 = sshll.u32 %s553_s15, 4  ;;  %p525_p8 = scmp.ne.s32.totalorder %s670_s5, %s524_s19  ;;  %s40_s16 = int_to_ptr.vmem [resolvable:$true] %s39_s16 }
  0x14   :  { %p528_p9 = scmp.lt.u32.totalorder %s524_s19, %s670_s5 }
  0x16   :  { %p530_p10 = pnand %p528_p9, %p525_p8 }
  0x18   :  { %533 = shalt.err (!%p530_p10)
}
  0x19   :  { %s534_s24 = scalar_lea.vmem %s40_s16, 1024  ;;  %p539_p12 = scmp.lt.s32.totalorder %s40_s16, %s40_s16 }
  0x1a   :  { %p535_p11 = scmp.ne.s32.totalorder %s40_s16, %s534_s24  ;;  %p540_p13 = scmp.lt.s32.totalorder %s534_s24, %s534_s24 }
  0x1c   :  { %p541_p0 = por %p540_p13, %p539_p12 }
  0x1e   :  { %p542_p1 = pnand %p541_p0, %p535_p11 }
  0x20   :  { %545 = shalt.err (!%p542_p1)
}
  0x21   :  { %45 = dma.hbm_to_vmem [thread:$0]  %s670_s5, 1024, %s40_s16, [#allocation5], %s551_s11, %s551_s11, %s552_s12  }
  0x22   :  { %546 = dma.done.wait [#allocation3], 1024  }
  0x23   :  { %547 = vsyncadd [#allocation3], 4294966272 }
  0x24   :  { %548 = dma.done.wait [#allocation5], 1024  }
  0x25   :  { %549 = vsyncadd [#allocation5], 4294966272  ;;  %v554_v0 = vmov 0.0   ;;  %vm555_vm0 = vmmov 0   ;;  %v483_v1 = vld [vmem:[%s666_s1] sm:$0xff]   ;;  %v484_v2 = vld [vmem:[%s666_s1 + $0x8] sm:$0xff]  }
  0x26   :  { %429 = vmatprep.subr.bf16.mxu0 %v554_v0  ;;  %433 = vmatprep.mubr.msk.bf16.mxu0 %vm555_vm0, %v554_v0  ;;  %v486_v3 = vld [vmem:[#allocation2] sm:$0xff]   ;;  %v485_v4 = vld [vmem:[%s665_s0] sm:$0xff]   ;;  %v487_v5 = vld [vmem:[#allocation2 + $0x8] sm:$0xff]   ;;  %vm85_vm1 = vcmask 261120  }
  0x27   :  { %437 = vmatprep.subr.bf16.mxu1 %v554_v0  ;;  %453 = vmatprep.mubr.msk.bf16.mxu1 %vm555_vm0, %v554_v0  ;;  %v488_v6 = vld [vmem:[#allocation2 + $0x10] sm:$0xff]   ;;  %v489_v7 = vld [vmem:[#allocation2 + $0x18] sm:$0xff]   ;;  %v490_v8 = vld [vmem:[#allocation2 + $0x20] sm:$0xff]  }
  0x28   :  { %430 = vmatpush3.bf16.msra.mxu0 %v483_v1  ;;  %438 = vmatpush3.bf16.msra.mxu1 %v486_v3  ;;  %v491_v9 = vld [vmem:[#allocation2 + $0x28] sm:$0xff]   ;;  %v492_v10 = vld [vmem:[#allocation2 + $0x30] sm:$0xff]   ;;  %v493_v11 = vld [vmem:[#allocation2 + $0x38] sm:$0xff]  }
  0x29   :  { %431 = vmatprep.subr.bf16.mxu0 %v554_v0  ;;  %439 = vmatprep.subr.bf16.mxu1 %v554_v0  ;;  %v494_v12 = vld [vmem:[#allocation4] sm:$0xff]   ;;  %v495_v13 = vld [vmem:[#allocation4 + $0x8] sm:$0xff]   ;;  %v496_v14 = vld [vmem:[#allocation4 + $0x10] sm:$0xff]  }
  0x2a   :  { %v497_v15 = vld [vmem:[#allocation4 + $0x18] sm:$0xff]   ;;  %v498_v16 = vld [vmem:[#allocation4 + $0x20] sm:$0xff]   ;;  %v499_v17 = vld [vmem:[#allocation4 + $0x28] sm:$0xff]  }
  0x2b   :  { %v376_v18 = vld [vmem:[%s667_s2] ss:$0 sm:$0xff]  ;;  %v501_v29 = vld [vmem:[#allocation4 + $0x38] sm:$0xff]  }
  0x2c   :  { %432 = vmatpush3.bf16.msra.mxu0 %v484_v2  ;;  %440 = vmatpush3.bf16.msra.mxu1 %v487_v5  ;;  %v500_v28 = vld [vmem:[#allocation4 + $0x30] sm:$0xff]  }
  0x2d   :  { %457 = vmatprep.subr.bf16.mxu0 %v554_v0  ;;  %441 = vmatprep.subr.bf16.mxu1 %v554_v0  ;;  %v381_v30 = vld [vmem:[%s669_s4] ss:$0 sm:$0xff] }
  0x2e   :  { %v390_v40 = vld [vmem:[%s671_s6] ss:$0 sm:$0xff] }
  0x2f   :  { %434 = vmatmul.mubr.msk.bf16.vlgmr.msra.gmra.mrb[0].mxu0 %vm85_vm1, %v485_v4 }
  0x30   :  { %473 = vmatprep.mubr.msk.bf16.mxu0 %vm555_vm0, %v554_v0  ;;  %442 = vmatpush3.bf16.msra.mxu1 %v488_v6 }
  0x31   :  { %443 = vmatprep.subr.bf16.mxu1 %v554_v0  ;;  %458 = vmatpush3.bf16.msra.mxu0 %v494_v12 }
  0x32   :  { %459 = vmatprep.subr.bf16.mxu0 %v554_v0 }
  0x34   :  { %444 = vmatpush3.bf16.msra.mxu1 %v489_v7 }
  0x35   :  { %445 = vmatprep.subr.bf16.mxu1 %v554_v0  ;;  %460 = vmatpush3.bf16.msra.mxu0 %v495_v13 }
  0x36   :  { %461 = vmatprep.subr.bf16.mxu0 %v554_v0 }
  0x38   :  { %446 = vmatpush3.bf16.msra.mxu1 %v490_v8 }
  0x39   :  { %447 = vmatprep.subr.bf16.mxu1 %v554_v0  ;;  %462 = vmatpush3.bf16.msra.mxu0 %v496_v14 }
  0x3a   :  { %463 = vmatprep.subr.bf16.mxu0 %v554_v0 }
  0x3c   :  { %448 = vmatpush3.bf16.msra.mxu1 %v491_v9 }
  0x3d   :  { %449 = vmatprep.subr.bf16.mxu1 %v554_v0  ;;  %464 = vmatpush3.bf16.msra.mxu0 %v497_v15 }
  0x3e   :  { %465 = vmatprep.subr.bf16.mxu0 %v554_v0 }
  0x40   :  { %450 = vmatpush3.bf16.msra.mxu1 %v492_v10 }
  0x41   :  { %451 = vmatprep.subr.bf16.mxu1 %v554_v0  ;;  %466 = vmatpush3.bf16.msra.mxu0 %v498_v16 }
  0x42   :  { %467 = vmatprep.subr.bf16.mxu0 %v554_v0 }
  0x44   :  { %452 = vmatpush3.bf16.msra.mxu1 %v493_v11 }
  0x45   :  { %468 = vmatpush3.bf16.msra.mxu0 %v499_v17 }
  0x46   :  { %469 = vmatprep.subr.bf16.mxu0 %v554_v0 }
  0x49   :  { %470 = vmatpush3.bf16.msra.mxu0 %v500_v28 }
  0x4a   :  { %471 = vmatprep.subr.bf16.mxu0 %v554_v0 }
  0x4d   :  { %472 = vmatpush3.bf16.msra.mxu0 %v501_v29 }
 0x102   :  { %v123_v19 = vpop.f32.mrb[0].mxu0 }
 0x103   :  { %v124_v20 = vadd.f32 %v376_v18, %v123_v19  ;;  %v435_v21 = vpop.f32.mrb[1].mxu0 }
 0x104   :  { %v126_v22 = vpop.f32.mrb[2].mxu0 }
 0x105   :  { %v127_v23 = vadd.f32 %v376_v18, %v126_v22  ;;  %v436_v24 = vpop.f32.mrb[3].mxu0  ;;  %v130_v25 = vmax.f32 %v124_v20, 0.0 }
 0x107   :  { %v131_v26 = vmax.f32 %v127_v23, 0.0 }
 0x109   :  { %v132_v27 = vpack.c.bf16 %v131_v26, %v130_v25 }
 0x10b   :  { %454 = vmatmul.mubr.bf16.vlgmr.msra.gmra.mrb[0].mxu1 %v132_v27 }
 0x1de   :  { %v238_v31 = vpop.f32.mrb[0].mxu1 }
 0x1df   :  { %v239_v32 = vadd.f32 %v381_v30, %v238_v31  ;;  %v455_v33 = vpop.f32.mrb[1].mxu1 }
 0x1e0   :  { %v241_v34 = vpop.f32.mrb[2].mxu1 }
 0x1e1   :  { %v242_v35 = vadd.f32 %v381_v30, %v241_v34  ;;  %v456_v36 = vpop.f32.mrb[3].mxu1  ;;  %v245_v37 = vmax.f32 %v239_v32, 0.0 }
 0x1e3   :  { %v246_v38 = vmax.f32 %v242_v35, 0.0 }
 0x1e5   :  { %v247_v39 = vpack.c.bf16 %v246_v38, %v245_v37 }
 0x1e7   :  { %474 = vmatmul.mubr.bf16.vlgmr.msra.gmra.mrb[4].mxu0 %v247_v39 }
 0x2ba   :  { %v353_v41 = vpop.f32.mrb[4].mxu0 }
 0x2bb   :  { %v475_v42 = vpop.f32.mrb[5].mxu0  ;;  %v354_v44 = vadd.f32 %v390_v40, %v353_v41 }
 0x2bc   :  { %v356_v43 = vpop.f32.mrb[6].mxu0 }
 0x2bd   :  { %v357_v45 = vadd.f32 %v390_v40, %v356_v43  ;;  %v476_v46 = vpop.f32.mrb[7].mxu0 }
 0x2bf   :  { %v406_v47 = vpack.c.bf16 %v357_v45, %v354_v44 }
 0x2c1   :  { %407 = vst [vmem:[%s672_s7] sm:$0xff] %v406_v47  }
 0x2c2   :  { %374 = vsyncpa [#allocation3], 1 }
 0x2c3   :  { %375 = vsyncpa [#allocation5], 1 }

</bundles_post_ra>
